<compile_context>
chip_gen: v5e
topology: v5e:2x2
jax: 0.10.0
libtpu: 0.0.40
codegen_flags: <defaults>
</compile_context>

<pallas_src>
import functools

import jax
import jax.numpy as jnp
import numpy as np
from jax.experimental import pallas as pl
from jax.experimental.pallas import tpu as pltpu

FINAL_BIAS_INIT = 0.0003
FINAL_WEIGHT_INIT = 0.003
LN_EPS = 1e-5  # torch.nn.LayerNorm default

LANE = 128
SUBLANE = 8


def _round_up(n, m):
    return ((n + m - 1) // m) * m


def _layernorm_padded(h, gamma, beta, n_true):
    # One-pass statistics. Padded lanes of h are exactly zero, so summing over
    # the padded width and dividing by the true feature count is exact; padded
    # gamma/beta lanes are zero, so padded output lanes stay zero.
    inv_n = 1.0 / float(n_true)
    s = jnp.sum(h, axis=-1, keepdims=True)
    s2 = jnp.sum(h * h, axis=-1, keepdims=True)
    mean = s * inv_n
    var = s2 * inv_n - mean * mean
    return (h - mean) * jax.lax.rsqrt(var + LN_EPS) * gamma + beta


def _actor_kernel(x_ref, w1_ref, vec1_ref, w2_ref, vec2_ref, wmu_ref, bmu_ref,
                  out_ref, *, h0_true, h1_true, a_true):
    x = x_ref[...]

    # --- layer 1: linear (bf16 MXU inputs, f32 acc) + LayerNorm + ReLU (f32) ---
    h = jnp.dot(x.astype(jnp.bfloat16), w1_ref[...],
                preferred_element_type=jnp.float32)
    h = h + vec1_ref[0:1, :]
    h = _layernorm_padded(h, vec1_ref[1:2, :], vec1_ref[2:3, :], h0_true)
    h = jnp.maximum(h, 0.0)

    # --- layer 2 ---
    h = jnp.dot(h.astype(jnp.bfloat16), w2_ref[...],
                preferred_element_type=jnp.float32)
    h = h + vec2_ref[0:1, :]
    h = _layernorm_padded(h, vec2_ref[1:2, :], vec2_ref[2:3, :], h1_true)
    h = jnp.maximum(h, 0.0)

    # --- mu head + tanh; store only the true action lanes (lane-narrow but
    #     HBM-minimal: 16x fewer output bytes than the padded buffer) ---
    mu = jnp.dot(h.astype(jnp.bfloat16), wmu_ref[...],
                 preferred_element_type=jnp.float32) + bmu_ref[...]
    out_ref[...] = jnp.tanh(mu[:, :a_true])


def pack_actor_params(p):
    """Pad feature dims to 128 lanes, pre-cast weights to bf16, pack LN vectors."""
    d_in, h0 = p["w1"].shape
    h1 = p["w2"].shape[1]
    a = p["w_mu"].shape[1]
    h0p, h1p, ap = _round_up(h0, LANE), _round_up(h1, LANE), _round_up(a, LANE)

    def pad2(m, rows, cols, dtype=jnp.float32):
        out = jnp.zeros((rows, cols), jnp.float32)
        out = out.at[:m.shape[0], :m.shape[1]].set(m.astype(jnp.float32))
        return out.astype(dtype)

    vec1 = (jnp.zeros((3, h0p), jnp.float32)
            .at[0, :h0].set(p["b1"].reshape(-1))
            .at[1, :h0].set(p["g1"].reshape(-1))
            .at[2, :h0].set(p["beta1"].reshape(-1)))
    vec2 = (jnp.zeros((3, h1p), jnp.float32)
            .at[0, :h1].set(p["b2"].reshape(-1))
            .at[1, :h1].set(p["g2"].reshape(-1))
            .at[2, :h1].set(p["beta2"].reshape(-1)))

    return dict(
        w1=pad2(p["w1"], d_in, h0p, jnp.bfloat16),
        vec1=vec1,
        w2=pad2(p["w2"], h0p, h1p, jnp.bfloat16),
        vec2=vec2,
        w_mu=pad2(p["w_mu"], h1p, ap, jnp.bfloat16),
        b_mu=pad2(p["b_mu"], 1, ap),
        dims=(int(h0), int(h1), int(a)),
    )


def actor_forward(x, packed, *, tile_b=4096):
    """x: (B, num_inputs) f32. packed: output of pack_actor_params."""
    B, d_in = x.shape
    h0, h1, a = packed["dims"]
    w1, vec1 = packed["w1"], packed["vec1"]
    w2, vec2 = packed["w2"], packed["vec2"]
    w_mu, b_mu = packed["w_mu"], packed["b_mu"]
    h0p, h1p, ap = w1.shape[1], w2.shape[1], w_mu.shape[1]

    # Batch tiling: multiples of 8 sublanes, large tiles to amortize the
    # ~0.35 us per-grid-step overhead, but keep >= 2 tiles when the batch
    # allows so v7x's second TensorCore has work ("parallel" axis).
    bp8 = _round_up(B, SUBLANE)
    tb_cap = min(_round_up(tile_b, SUBLANE), bp8)
    ntiles = pl.cdiv(bp8, tb_cap)
    if ntiles == 1 and bp8 >= 2 * SUBLANE:
        ntiles = 2
    tb = _round_up(pl.cdiv(bp8, ntiles), SUBLANE)
    bp = ntiles * tb
    if bp != B:
        x = jnp.pad(x, ((0, bp - B), (0, 0)))
    grid = (ntiles,)

    kernel = functools.partial(_actor_kernel, h0_true=h0, h1_true=h1, a_true=a)

    flops = 2 * bp * (d_in * h0p + h0p * h1p + h1p * ap)
    transcendentals = bp * (a + 2)  # tanh per true output lane + 2 rsqrt per row
    bytes_accessed = (4 * (bp * d_in + bp * a + vec1.size + vec2.size + b_mu.size)
                      + 2 * (w1.size + w2.size + w_mu.size))

    out = pl.pallas_call(
        kernel,
        out_shape=jax.ShapeDtypeStruct((bp, a), jnp.float32),
        grid_spec=pltpu.PrefetchScalarGridSpec(
            num_scalar_prefetch=0,
            grid=grid,
            in_specs=[
                pl.BlockSpec((tb, d_in), lambda i: (i, 0)),    # x: batch-tiled
                pl.BlockSpec((d_in, h0p), lambda i: (0, 0)),   # bf16 weights: VMEM-resident
                pl.BlockSpec((3, h0p), lambda i: (0, 0)),
                pl.BlockSpec((h0p, h1p), lambda i: (0, 0)),
                pl.BlockSpec((3, h1p), lambda i: (0, 0)),
                pl.BlockSpec((h1p, ap), lambda i: (0, 0)),
                pl.BlockSpec((1, ap), lambda i: (0, 0)),
            ],
            out_specs=pl.BlockSpec((tb, a), lambda i: (i, 0)),  # unpadded action lanes
        ),
        compiler_params=pltpu.CompilerParams(
            dimension_semantics=("parallel",),
            vmem_limit_bytes=32 * 1024 * 1024,  # v5e scoped default is 16 MiB
        ),
        cost_estimate=pl.CostEstimate(
            flops=flops,
            transcendentals=transcendentals,
            bytes_accessed=bytes_accessed,
        ),
    )(x, w1, vec1, w2, vec2, w_mu, b_mu)

    # Only padded batch rows to strip; the column padding never reaches HBM.
    return out[:B] if bp != B else out


def init_actor_params(key, num_inputs, hidden_size, action_dim):
    """Deterministic fan-in uniform init, mirroring Actor.initialize_weights()."""
    k1, k2, k3, k4, k5, k6 = jax.random.split(key, 6)
    h0, h1 = hidden_size

    w = 1.0 / np.sqrt(num_inputs)
    w1 = jax.random.uniform(k1, (num_inputs, h0), jnp.float32, -w, w)
    b1 = jax.random.uniform(k2, (1, h0), jnp.float32, -w, w)

    w = 1.0 / np.sqrt(h0)
    w2 = jax.random.uniform(k3, (h0, h1), jnp.float32, -w, w)
    b2 = jax.random.uniform(k4, (1, h1), jnp.float32, -w, w)

    w_mu = jax.random.uniform(k5, (h1, action_dim), jnp.float32,
                              -FINAL_WEIGHT_INIT, FINAL_WEIGHT_INIT)
    b_mu = jax.random.uniform(k6, (1, action_dim), jnp.float32,
                              -FINAL_BIAS_INIT, FINAL_BIAS_INIT)

    return dict(
        w1=w1, b1=b1, g1=jnp.ones((1, h0), jnp.float32), beta1=jnp.zeros((1, h0), jnp.float32),
        w2=w2, b2=b2, g2=jnp.ones((1, h1), jnp.float32), beta2=jnp.zeros((1, h1), jnp.float32),
        w_mu=w_mu, b_mu=b_mu,
    )


def _layernorm_ref(x, gamma, beta):
    mean = jnp.mean(x, axis=-1, keepdims=True)
    var = jnp.mean(jnp.square(x - mean), axis=-1, keepdims=True)
    return (x - mean) * jax.lax.rsqrt(var + LN_EPS) * gamma + beta


def actor_reference(x, p):
    """Pure-JAX f32 reference for correctness checking."""
    h = x @ p["w1"] + p["b1"]
    h = _layernorm_ref(h, p["g1"], p["beta1"])
    h = jnp.maximum(h, 0.0)
    h = h @ p["w2"] + p["b2"]
    h = _layernorm_ref(h, p["g2"], p["beta2"])
    h = jnp.maximum(h, 0.0)
    return jnp.tanh(h @ p["w_mu"] + p["b_mu"])


if __name__ == "__main__":
    key = jax.random.PRNGKey(0)
    k_param, k_x = jax.random.split(key)

    batch = 8
    num_inputs = 32
    hidden_size = [64, 64]
    action_dim = 8

    params = init_actor_params(k_param, num_inputs, hidden_size, action_dim)
    packed = pack_actor_params(params)
    x = jax.random.normal(k_x, (batch, num_inputs), jnp.float32)

    out = actor_forward(x, packed)
    out = jax.block_until_ready(out)

    ref = actor_reference(x, params)
    # bf16 MXU inputs / bf16 resident weights (f32 accumulation) -> relaxed
    # tolerance vs. the pure-f32 reference.
    np.testing.assert_allclose(np.asarray(out), np.asarray(ref), rtol=2e-2, atol=2e-2)

    print("KERNEL_OK")
</pallas_src>

<mosaic_0001>
module attributes {stable_mosaic.version = 11 : i64} {
  func.func @_actor_kernel(%arg0: i32, %arg1: memref<8x32xf32, #tpu.memory_space<vmem>>, %arg2: memref<32x128xbf16, #tpu.memory_space<vmem>>, %arg3: memref<3x128xf32, #tpu.memory_space<vmem>>, %arg4: memref<128x128xbf16, #tpu.memory_space<vmem>>, %arg5: memref<3x128xf32, #tpu.memory_space<vmem>>, %arg6: memref<128x128xbf16, #tpu.memory_space<vmem>>, %arg7: memref<1x128xf32, #tpu.memory_space<vmem>>, %arg8: memref<8x8xf32, #tpu.memory_space<vmem>>) attributes {dimension_semantics = [#tpu.dimension_semantics<parallel>], iteration_bounds = array<i64: 1>, scalar_prefetch = 0 : i64, scratch_operands = 0 : i64, tpu.core_type = #tpu.core_type<tc>, window_params = [{transform_indices = @transform_0, window_bounds = array<i64: 8, 32>}, {pipeline_mode = #tpu.pipeline_mode<synchronous>, transform_indices = @transform_1, window_bounds = array<i64: 32, 128>}, {pipeline_mode = #tpu.pipeline_mode<synchronous>, transform_indices = @transform_2, window_bounds = array<i64: 3, 128>}, {pipeline_mode = #tpu.pipeline_mode<synchronous>, transform_indices = @transform_3, window_bounds = array<i64: 128, 128>}, {pipeline_mode = #tpu.pipeline_mode<synchronous>, transform_indices = @transform_4, window_bounds = array<i64: 3, 128>}, {pipeline_mode = #tpu.pipeline_mode<synchronous>, transform_indices = @transform_5, window_bounds = array<i64: 128, 128>}, {pipeline_mode = #tpu.pipeline_mode<synchronous>, transform_indices = @transform_6, window_bounds = array<i64: 1, 128>}, {transform_indices = @transform_7, window_bounds = array<i64: 8, 8>}]} {
    %c0 = arith.constant 0 : index
    %c0_0 = arith.constant 0 : index
    %0 = vector.load %arg1[%c0, %c0_0] : memref<8x32xf32, #tpu.memory_space<vmem>>, vector<8x32xf32>
    %1 = arith.truncf %0 : vector<8x32xf32> to vector<8x32xbf16>
    %c0_1 = arith.constant 0 : index
    %c0_2 = arith.constant 0 : index
    %2 = vector.load %arg2[%c0_1, %c0_2] : memref<32x128xbf16, #tpu.memory_space<vmem>>, vector<32x128xbf16>
    %cst = arith.constant dense<0.000000e+00> : vector<8x128xf32>
    %3 = tpu.matmul %1, %2, %cst {dimension_numbers = #tpu.dot_dimension_numbers<[1], [0], [0], [1], [0, 0, 1, 1], [], []>} : vector<8x32xbf16>, vector<32x128xbf16>, vector<8x128xf32> -> vector<8x128xf32>
    %c0_3 = arith.constant 0 : index
    %c0_4 = arith.constant 0 : index
    %4 = vector.load %arg3[%c0_3, %c0_4] : memref<3x128xf32, #tpu.memory_space<vmem>>, vector<1x128xf32>
    %5 = vector.broadcast %4 : vector<1x128xf32> to vector<8x128xf32>
    %6 = arith.addf %3, %5 : vector<8x128xf32>
    %c1 = arith.constant 1 : index
    %c0_5 = arith.constant 0 : index
    %7 = vector.load %arg3[%c1, %c0_5] : memref<3x128xf32, #tpu.memory_space<vmem>>, vector<1x128xf32>
    %c2 = arith.constant 2 : index
    %c0_6 = arith.constant 0 : index
    %8 = vector.load %arg3[%c2, %c0_6] : memref<3x128xf32, #tpu.memory_space<vmem>>, vector<1x128xf32>
    %cst_7 = arith.constant dense<0.000000e+00> : vector<8xf32>
    %9 = vector.multi_reduction <add>, %6, %cst_7 [1] : vector<8x128xf32> to vector<8xf32>
    %10 = vector.shape_cast %9 : vector<8xf32> to vector<8x1xf32>
    %11 = arith.mulf %6, %6 : vector<8x128xf32>
    %cst_8 = arith.constant dense<0.000000e+00> : vector<8xf32>
    %12 = vector.multi_reduction <add>, %11, %cst_8 [1] : vector<8x128xf32> to vector<8xf32>
    %13 = vector.shape_cast %12 : vector<8xf32> to vector<8x1xf32>
    %cst_9 = arith.constant 1.562500e-02 : f32
    %14 = vector.broadcast %cst_9 : f32 to vector<8x1xf32>
    %15 = arith.mulf %10, %14 : vector<8x1xf32>
    %cst_10 = arith.constant 1.562500e-02 : f32
    %16 = vector.broadcast %cst_10 : f32 to vector<8x1xf32>
    %17 = arith.mulf %13, %16 : vector<8x1xf32>
    %18 = arith.mulf %15, %15 : vector<8x1xf32>
    %19 = arith.subf %17, %18 : vector<8x1xf32>
    %20 = vector.broadcast %15 : vector<8x1xf32> to vector<8x128xf32>
    %21 = arith.subf %6, %20 : vector<8x128xf32>
    %cst_11 = arith.constant 9.99999974E-6 : f32
    %22 = vector.broadcast %cst_11 : f32 to vector<8x1xf32>
    %23 = arith.addf %19, %22 : vector<8x1xf32>
    %24 = math.rsqrt %23 : vector<8x1xf32>
    %25 = vector.broadcast %24 : vector<8x1xf32> to vector<8x128xf32>
    %26 = arith.mulf %21, %25 : vector<8x128xf32>
    %27 = vector.broadcast %7 : vector<1x128xf32> to vector<8x128xf32>
    %28 = arith.mulf %26, %27 : vector<8x128xf32>
    %29 = vector.broadcast %8 : vector<1x128xf32> to vector<8x128xf32>
    %30 = arith.addf %28, %29 : vector<8x128xf32>
    %cst_12 = arith.constant 0.000000e+00 : f32
    %31 = vector.broadcast %cst_12 : f32 to vector<8x128xf32>
    %32 = arith.maximumf %30, %31 : vector<8x128xf32>
    %33 = arith.truncf %32 : vector<8x128xf32> to vector<8x128xbf16>
    %c0_13 = arith.constant 0 : index
    %c0_14 = arith.constant 0 : index
    %34 = vector.load %arg4[%c0_13, %c0_14] : memref<128x128xbf16, #tpu.memory_space<vmem>>, vector<128x128xbf16>
    %cst_15 = arith.constant dense<0.000000e+00> : vector<8x128xf32>
    %35 = tpu.matmul %33, %34, %cst_15 {dimension_numbers = #tpu.dot_dimension_numbers<[1], [0], [0], [1], [0, 0, 1, 1], [], []>} : vector<8x128xbf16>, vector<128x128xbf16>, vector<8x128xf32> -> vector<8x128xf32>
    %c0_16 = arith.constant 0 : index
    %c0_17 = arith.constant 0 : index
    %36 = vector.load %arg5[%c0_16, %c0_17] : memref<3x128xf32, #tpu.memory_space<vmem>>, vector<1x128xf32>
    %37 = vector.broadcast %36 : vector<1x128xf32> to vector<8x128xf32>
    %38 = arith.addf %35, %37 : vector<8x128xf32>
    %c1_18 = arith.constant 1 : index
    %c0_19 = arith.constant 0 : index
    %39 = vector.load %arg5[%c1_18, %c0_19] : memref<3x128xf32, #tpu.memory_space<vmem>>, vector<1x128xf32>
    %c2_20 = arith.constant 2 : index
    %c0_21 = arith.constant 0 : index
    %40 = vector.load %arg5[%c2_20, %c0_21] : memref<3x128xf32, #tpu.memory_space<vmem>>, vector<1x128xf32>
    %cst_22 = arith.constant dense<0.000000e+00> : vector<8xf32>
    %41 = vector.multi_reduction <add>, %38, %cst_22 [1] : vector<8x128xf32> to vector<8xf32>
    %42 = vector.shape_cast %41 : vector<8xf32> to vector<8x1xf32>
    %43 = arith.mulf %38, %38 : vector<8x128xf32>
    %cst_23 = arith.constant dense<0.000000e+00> : vector<8xf32>
    %44 = vector.multi_reduction <add>, %43, %cst_23 [1] : vector<8x128xf32> to vector<8xf32>
    %45 = vector.shape_cast %44 : vector<8xf32> to vector<8x1xf32>
    %cst_24 = arith.constant 1.562500e-02 : f32
    %46 = vector.broadcast %cst_24 : f32 to vector<8x1xf32>
    %47 = arith.mulf %42, %46 : vector<8x1xf32>
    %cst_25 = arith.constant 1.562500e-02 : f32
    %48 = vector.broadcast %cst_25 : f32 to vector<8x1xf32>
    %49 = arith.mulf %45, %48 : vector<8x1xf32>
    %50 = arith.mulf %47, %47 : vector<8x1xf32>
    %51 = arith.subf %49, %50 : vector<8x1xf32>
    %52 = vector.broadcast %47 : vector<8x1xf32> to vector<8x128xf32>
    %53 = arith.subf %38, %52 : vector<8x128xf32>
    %cst_26 = arith.constant 9.99999974E-6 : f32
    %54 = vector.broadcast %cst_26 : f32 to vector<8x1xf32>
    %55 = arith.addf %51, %54 : vector<8x1xf32>
    %56 = math.rsqrt %55 : vector<8x1xf32>
    %57 = vector.broadcast %56 : vector<8x1xf32> to vector<8x128xf32>
    %58 = arith.mulf %53, %57 : vector<8x128xf32>
    %59 = vector.broadcast %39 : vector<1x128xf32> to vector<8x128xf32>
    %60 = arith.mulf %58, %59 : vector<8x128xf32>
    %61 = vector.broadcast %40 : vector<1x128xf32> to vector<8x128xf32>
    %62 = arith.addf %60, %61 : vector<8x128xf32>
    %cst_27 = arith.constant 0.000000e+00 : f32
    %63 = vector.broadcast %cst_27 : f32 to vector<8x128xf32>
    %64 = arith.maximumf %62, %63 : vector<8x128xf32>
    %65 = arith.truncf %64 : vector<8x128xf32> to vector<8x128xbf16>
    %c0_28 = arith.constant 0 : index
    %c0_29 = arith.constant 0 : index
    %66 = vector.load %arg6[%c0_28, %c0_29] : memref<128x128xbf16, #tpu.memory_space<vmem>>, vector<128x128xbf16>
    %cst_30 = arith.constant dense<0.000000e+00> : vector<8x128xf32>
    %67 = tpu.matmul %65, %66, %cst_30 {dimension_numbers = #tpu.dot_dimension_numbers<[1], [0], [0], [1], [0, 0, 1, 1], [], []>} : vector<8x128xbf16>, vector<128x128xbf16>, vector<8x128xf32> -> vector<8x128xf32>
    %c0_31 = arith.constant 0 : index
    %c0_32 = arith.constant 0 : index
    %68 = vector.load %arg7[%c0_31, %c0_32] : memref<1x128xf32, #tpu.memory_space<vmem>>, vector<1x128xf32>
    %69 = vector.broadcast %68 : vector<1x128xf32> to vector<8x128xf32>
    %70 = arith.addf %67, %69 : vector<8x128xf32>
    %71 = vector.extract_strided_slice %70 {offsets = [0, 0], sizes = [8, 8], strides = [1, 1]} : vector<8x128xf32> to vector<8x8xf32>
    %72 = math.tanh %71 : vector<8x8xf32>
    %c0_33 = arith.constant 0 : index
    %c0_34 = arith.constant 0 : index
    %73 = vector.load %arg8[%c0_33, %c0_34] : memref<8x8xf32, #tpu.memory_space<vmem>>, vector<8x8xf32>
    tpu.vector_store %arg8[%c0_33, %c0_34], %72 {strides = array<i32>} : memref<8x8xf32, #tpu.memory_space<vmem>>, vector<8x8xf32>,
    return
  }
  func.func @transform_0(%arg0: i32) -> (i32, i32) {
    %c0_i32 = arith.constant 0 : i32
    %c0_i32_0 = arith.constant 0 : i32
    return %arg0, %c0_i32 : i32, i32
  }
  func.func @transform_1(%arg0: i32) -> (i32, i32) {
    %c0_i32 = arith.constant 0 : i32
    %c0_i32_0 = arith.constant 0 : i32
    %c0_i32_1 = arith.constant 0 : i32
    return %c0_i32, %c0_i32_0 : i32, i32
  }
  func.func @transform_2(%arg0: i32) -> (i32, i32) {
    %c0_i32 = arith.constant 0 : i32
    %c0_i32_0 = arith.constant 0 : i32
    %c0_i32_1 = arith.constant 0 : i32
    return %c0_i32, %c0_i32_0 : i32, i32
  }
  func.func @transform_3(%arg0: i32) -> (i32, i32) {
    %c0_i32 = arith.constant 0 : i32
    %c0_i32_0 = arith.constant 0 : i32
    %c0_i32_1 = arith.constant 0 : i32
    return %c0_i32, %c0_i32_0 : i32, i32
  }
  func.func @transform_4(%arg0: i32) -> (i32, i32) {
    %c0_i32 = arith.constant 0 : i32
    %c0_i32_0 = arith.constant 0 : i32
    %c0_i32_1 = arith.constant 0 : i32
    return %c0_i32, %c0_i32_0 : i32, i32
  }
  func.func @transform_5(%arg0: i32) -> (i32, i32) {
    %c0_i32 = arith.constant 0 : i32
    %c0_i32_0 = arith.constant 0 : i32
    %c0_i32_1 = arith.constant 0 : i32
    return %c0_i32, %c0_i32_0 : i32, i32
  }
  func.func @transform_6(%arg0: i32) -> (i32, i32) {
    %c0_i32 = arith.constant 0 : i32
    %c0_i32_0 = arith.constant 0 : i32
    %c0_i32_1 = arith.constant 0 : i32
    return %c0_i32, %c0_i32_0 : i32, i32
  }
  func.func @transform_7(%arg0: i32) -> (i32, i32) {
    %c0_i32 = arith.constant 0 : i32
    %c0_i32_0 = arith.constant 0 : i32
    return %arg0, %c0_i32 : i32, i32
  }
}

</mosaic_0001>

<bundles_post_ra>
// kernel: tpu_custom_call.1
= control target key start
LH: loop header
LB: loop body
LE: loop exit
PB: predicated region body
PF: predicated region fallthrough
CT: control target
= control target key end

     0   :  { %12 = vsyncpa [#allocation3], 0  ;;  %s769_s0 = inlined_call_operand.hbm [shape: f32[8,32], index: 0, kind: input, shape index: {}]   ;;  %s770_s1 = inlined_call_operand.hbm [shape: bf16[32,128], index: 1, kind: input, shape index: {}]   ;;  %s771_s2 = inlined_call_operand.hbm [shape: f32[3,128], index: 2, kind: input, shape index: {}]   ;;  %s772_s3 = inlined_call_operand.hbm [shape: bf16[128,128], index: 3, kind: input, shape index: {}]   ;;  %s773_s4 = inlined_call_operand.hbm [shape: f32[3,128], index: 4, kind: input, shape index: {}]   ;;  %s774_s5 = inlined_call_operand.hbm [shape: bf16[128,128], index: 5, kind: input, shape index: {}]   ;;  %s775_s6 = inlined_call_operand.vmem [shape: f32[1,128], index: 6, kind: input, shape index: {}]   ;;  %s776_s7 = inlined_call_operand.hbm [shape: f32[8,8], index: 7, kind: output, shape index: {}]  }
   0x1   :  { %13 = vsyncpa [#allocation6], 0 }
   0x2   :  { %14 = vsyncpa [#allocation9], 0 }
   0x3   :  { %15 = vsyncpa [#allocation12], 0  ;;  %s32_s26 = sshll.u32 %s770_s1, 4  ;;  %s33_s26 = int_to_ptr.hbm [resolvable:$true] %s32_s26 }
   0x4   :  { %16 = vsyncpa [#allocation4], 0  ;;  %s687_s27 = smov [#allocation5]   ;;  %s56_s8 = sshll.u32 %s772_s3, 4  ;;  %s57_s8 = int_to_ptr.hbm [resolvable:$true] %s56_s8 }
   0x5   :  { %s34_s28 = sshll.u32 %s687_s27, 4  ;;  %s688_s9 = smov 64   ;;  %s35_s28 = int_to_ptr.vmem [resolvable:$true] %s34_s28 }
   0x6   :  { %s689_s10 = smov 4   ;;  %s690_s11 = smov [#allocation8]  }
   0x7   :  { %40 = dma.hbm_to_vmem [thread:$0]  %s33_s26, 256, %s35_s28, [#allocation6], %s688_s9, %s688_s9, %s689_s10  }
   0x8   :  { %s58_s12 = sshll.u32 %s690_s11, 4  ;;  %s22_s14 = sshll.u32 %s769_s0, 4  ;;  %s59_s12 = int_to_ptr.vmem [resolvable:$true] %s58_s12  ;;  %s23_s14 = int_to_ptr.hbm [resolvable:$true] %s22_s14 }
   0x9   :  { %64 = dma.hbm_to_vmem [thread:$0]  %s57_s8, 1024, %s59_s12, [#allocation9], %s688_s9, %s688_s9, %s689_s10  }
   0xa   :  { %s46_s16 = sshll.u32 %s771_s2, 4  ;;  %s691_s17 = smov [#allocation2]   ;;  %s47_s16 = int_to_ptr.hbm [resolvable:$true] %s46_s16 }
   0xb   :  { %s24_s18 = sshll.u32 %s691_s17, 4  ;;  %s692_s19 = smov [#allocation7]   ;;  %s25_s18 = int_to_ptr.vmem [resolvable:$true] %s24_s18 }
   0xc   :  { %27 = dma.hbm_to_vmem [thread:$0]  %s23_s14, 128, %s25_s18, [#allocation3]  }
   0xd   :  { %s48_s20 = sshll.u32 %s692_s19, 4  ;;  %s70_s0 = sshll.u32 %s773_s4, 4  ;;  %s49_s20 = int_to_ptr.vmem [resolvable:$true] %s48_s20  ;;  %s71_s0 = int_to_ptr.hbm [resolvable:$true] %s70_s0 }
   0xe   :  { %51 = dma.hbm_to_vmem [thread:$0]  %s47_s16, 64, %s49_s20, [#allocation6]  }
   0xf   :  { %s80_s25 = sshll.u32 %s774_s5, 4  ;;  %s693_s26 = smov [#allocation10]   ;;  %s81_s25 = int_to_ptr.hbm [resolvable:$true] %s80_s25 }
  0x10   :  { %s72_s2 = sshll.u32 %s693_s26, 4  ;;  %s694_s27 = smov [#allocation11]   ;;  %s73_s2 = int_to_ptr.vmem [resolvable:$true] %s72_s2 }
  0x11   :  { %75 = dma.hbm_to_vmem [thread:$0]  %s71_s0, 64, %s73_s2, [#allocation9]  }
  0x12   :  { %s82_s28 = sshll.u32 %s694_s27, 4  ;;  %s83_s28 = int_to_ptr.vmem [resolvable:$true] %s82_s28 }
  0x13   :  { %88 = dma.hbm_to_vmem [thread:$0]  %s81_s25, 1024, %s83_s28, [#allocation12], %s688_s9, %s688_s9, %s689_s10  }
  0x14   :  { %677 = dma.done.wait [#allocation3], 128  }
  0x15   :  { %678 = vsyncadd [#allocation3], 4294967168 }
  0x16   :  { %679 = dma.done.wait [#allocation6], 320  }
  0x17   :  { %680 = vsyncadd [#allocation6], 4294966976 }
  0x18   :  { %681 = dma.done.wait [#allocation9], 1088  }
  0x19   :  { %682 = vsyncadd [#allocation9], 4294966208 }
  0x1a   :  { %683 = dma.done.wait [#allocation12], 1024  }
  0x1b   :  { %684 = vsyncadd [#allocation12], 4294966272  ;;  %v470_v0 = vld [vmem:[#allocation5 + $0x8] sm:$0xff]  ;;  %v469_v1 = vld [vmem:[#allocation5] sm:$0xff]  ;;  %vm136_vm0 = vcmask 261120   ;;  %s695_s29 = smov [#allocation13]  }
  0x1c   :  { %v116_v2 = vld [vmem:[#allocation2] sm:$0xff]  ;;  %146 = vmatpush.bf16.msra.mxu0 %v470_v0  ;;  %v496_v4 = vld [vmem:[#allocation7] ss:$0 sm:$0xff]  ;;  %v477_v10 = vld [vmem:[#allocation8 + $0x30] sm:$0xff]  ;;  %s381_s30 = sshll.u32 %s695_s29, 4  ;;  %s383_s10 = sshll.u32 %s776_s7, 4  ;;  %s382_s30 = int_to_ptr.vmem [resolvable:$true] %s381_s30  ;;  %s384_s10 = int_to_ptr.hbm [resolvable:$true] %s383_s10 }
  0x1d   :  { %v117_v3 = vpack.c.bf16 %v116_v2, %v116_v2  ;;  %v478_v9 = vld [vmem:[#allocation8 + $0x38] sm:$0xff]  ;;  %v476_v11 = vld [vmem:[#allocation8 + $0x28] sm:$0xff]  ;;  %v475_v12 = vld [vmem:[#allocation8 + $0x20] sm:$0xff]  ;;  %vm374_vm7 = vcmask 64512  }
  0x1e   :  { %249 = vmatpush.bf16.msra.mxu1 %v478_v9  ;;  %v474_v13 = vld [vmem:[#allocation8 + $0x18] sm:$0xff]  ;;  %v473_v14 = vld [vmem:[#allocation8 + $0x10] sm:$0xff]  ;;  %v472_v16 = vld [vmem:[#allocation8 + $0x8] sm:$0xff] }
  0x1f   :  { %v471_v17 = vld [vmem:[#allocation8] sm:$0xff]  ;;  %v497_v31 = vld [vmem:[#allocation7 + $0x1] ss:$0 sm:$0xff]  ;;  %v498_v34 = vld [vmem:[#allocation7 + $0x2] ss:$0 sm:$0xff] }
  0x20   :  { %147 = vmatpush.bf16.msra.mxu0 %v469_v1  ;;  %v499_v39 = vld [vmem:[#allocation10] ss:$0 sm:$0xff]  ;;  %v485_v45 = vld [vmem:[#allocation11 + $0x30] sm:$0xff]  ;;  %v484_v46 = vld [vmem:[#allocation11 + $0x28] sm:$0xff] }
  0x21   :  { %v486_v44 = vld [vmem:[#allocation11 + $0x38] sm:$0xff]  ;;  %v483_v47 = vld [vmem:[#allocation11 + $0x20] sm:$0xff]  ;;  %v481_v49 = vld [vmem:[#allocation11 + $0x10] sm:$0xff] }
  0x22   :  { %250 = vmatpush.bf16.msra.mxu1 %v477_v10  ;;  %360 = vmatpush.bf16.msra.mxu2 %v486_v44  ;;  %v482_v48 = vld [vmem:[#allocation11 + $0x18] sm:$0xff]  ;;  %v480_v51 = vld [vmem:[#allocation11 + $0x8] sm:$0xff]  ;;  %v479_v52 = vld [vmem:[#allocation11] sm:$0xff] }
  0x23   :  { %404 = vmatmul.msk.bf16.vlgmr.msra.gmra.mxu0 %vm136_vm0, %v117_v3  ;;  %v500_v2 = vld [vmem:[#allocation10 + $0x1] ss:$0 sm:$0xff]  ;;  %v502_v10 = vld [vmem:[%s775_s6] ss:$0 sm:$0xff] }
  0x26   :  { %251 = vmatpush.bf16.msra.mxu1 %v476_v11  ;;  %361 = vmatpush.bf16.msra.mxu2 %v485_v45 }
  0x2a   :  { %252 = vmatpush.bf16.msra.mxu1 %v475_v12  ;;  %362 = vmatpush.bf16.msra.mxu2 %v484_v46 }
  0x2e   :  { %253 = vmatpush.bf16.msra.mxu1 %v474_v13  ;;  %363 = vmatpush.bf16.msra.mxu2 %v483_v47 }
  0x32   :  { %254 = vmatpush.bf16.msra.mxu1 %v473_v14  ;;  %364 = vmatpush.bf16.msra.mxu2 %v482_v48 }
  0x36   :  { %255 = vmatpush.bf16.msra.mxu1 %v472_v16  ;;  %365 = vmatpush.bf16.msra.mxu2 %v481_v49 }
  0x3a   :  { %256 = vmatpush.bf16.msra.mxu1 %v471_v17  ;;  %366 = vmatpush.bf16.msra.mxu2 %v480_v51 }
  0x3e   :  { %367 = vmatpush.bf16.msra.mxu2 %v479_v52 }
  0xa0   :  { %v149_v5 = vpop.f32.mrf.mxu0 }
  0xa1   :  { %v150_v6 = vadd.f32 %v496_v4, %v149_v5  ;;  %v501_v5 = vld [vmem:[#allocation10 + $0x2] ss:$0 sm:$0xff] }
  0xa3   :  { %155 = vadd.xlane.f32.xlu0 %v150_v6  ;;  %v157_v8 = vmul.f32 %v150_v6, %v150_v6 }
  0xa8   :  { %v151_v7 = vpop.f32.mrf.mxu0 }
  0xab   :  { %158 = vadd.xlane.f32.xlu0 %v157_v8 }
 0x116   :  { %v156_v15 = vpop.xlane.xlu0 %155 }
 0x117   :  { %v160_v18 = vmul.f32 0.015625, %v156_v15 }
 0x119   :  { %v162_v20 = vmul.f32 %v160_v18, %v160_v18  ;;  %v164_v30 = vsub.f32 %v150_v6, %v160_v18 }
 0x11e   :  { %v159_v19 = vpop.xlane.xlu0 %158 }
 0x11f   :  { %v161_v21 = vmul.f32 0.015625, %v159_v19 }
 0x121   :  { %v163_v22 = vsub.f32 %v161_v21, %v162_v20 }
 0x123   :  { %v165_v23 = vadd.f32 1e-05, %v163_v22 }
 0x125   :  { %503 = vrsqrt.f32 %v165_v23  ;;  %vm172_vm2 = vweird.f32 %v165_v23 }
 0x12b   :  { %v504_v24 = vpop.eup %503 }
 0x12c   :  { %v167_v25 = vmul.f32 %v504_v24, %v165_v23  ;;  %vm173_vm1 = vweird.f32 %v504_v24 }
 0x12d   :  { %vm174_vm3 = vmor %vm172_vm2, %vm173_vm1 }
 0x12e   :  { %v168_v26 = vmul.f32 %v504_v24, %v167_v25 }
 0x130   :  { %v169_v27 = vmul.f32 0.5, %v168_v26 }
 0x132   :  { %v170_v28 = vsub.f32 1.5, %v169_v27 }
 0x134   :  { %v171_v29 = vmul.f32 %v504_v24, %v170_v28 }
 0x136   :  { %v175_v32 = vsel %vm174_vm3, %v504_v24, %v171_v29 }
 0x137   :  { %v176_v33 = vmul.f32 %v175_v32, %v164_v30 }
 0x139   :  { %v178_v35 = vmul.f32 %v497_v31, %v176_v33 }
 0x13b   :  { %v180_v36 = vadd.f32 %v498_v34, %v178_v35 }
 0x13d   :  { %v181_v37 = vmax.f32 %v180_v36, 0.0 }
 0x13f   :  { %v182_v38 = vpack.c.bf16 %v181_v37, %v181_v37 }
 0x141   :  { %257 = vmatmul.bf16.vlgmr.msra.gmra.mxu1 %v182_v38 }
 0x1be   :  { %v258_v40 = vpop.f32.mrf.mxu1 }
 0x1bf   :  { %v259_v41 = vadd.f32 %v499_v39, %v258_v40 }
 0x1c1   :  { %264 = vadd.xlane.f32.xlu1 %v259_v41  ;;  %v266_v43 = vmul.f32 %v259_v41, %v259_v41 }
 0x1c6   :  { %v260_v42 = vpop.f32.mrf.mxu1 }
 0x1c9   :  { %267 = vadd.xlane.f32.xlu1 %v266_v43 }
 0x234   :  { %v265_v50 = vpop.xlane.xlu1 %264 }
 0x235   :  { %v269_v53 = vmul.f32 0.015625, %v265_v50 }
 0x237   :  { %v271_v55 = vmul.f32 %v269_v53, %v269_v53  ;;  %v273_v1 = vsub.f32 %v259_v41, %v269_v53 }
 0x23c   :  { %v268_v54 = vpop.xlane.xlu1 %267 }
 0x23d   :  { %v270_v56 = vmul.f32 0.015625, %v268_v54 }
 0x23f   :  { %v272_v57 = vsub.f32 %v270_v56, %v271_v55 }
 0x241   :  { %v274_v58 = vadd.f32 1e-05, %v272_v57 }
 0x243   :  { %505 = vrsqrt.f32 %v274_v58  ;;  %vm281_vm5 = vweird.f32 %v274_v58 }
 0x249   :  { %v506_v59 = vpop.eup %505 }
 0x24a   :  { %v276_v60 = vmul.f32 %v506_v59, %v274_v58  ;;  %vm282_vm4 = vweird.f32 %v506_v59 }
 0x24b   :  { %vm283_vm6 = vmor %vm281_vm5, %vm282_vm4 }
 0x24c   :  { %v277_v61 = vmul.f32 %v506_v59, %v276_v60 }
 0x24e   :  { %v278_v62 = vmul.f32 0.5, %v277_v61 }
 0x250   :  { %v279_v63 = vsub.f32 1.5, %v278_v62 }
 0x252   :  { %v280_v0 = vmul.f32 %v506_v59, %v279_v63 }
 0x254   :  { %v284_v3 = vsel %vm283_vm6, %v506_v59, %v280_v0 }
 0x255   :  { %v285_v4 = vmul.f32 %v284_v3, %v273_v1 }
 0x257   :  { %v287_v6 = vmul.f32 %v500_v2, %v285_v4 }
 0x259   :  { %v289_v7 = vadd.f32 %v501_v5, %v287_v6 }
 0x25b   :  { %v290_v8 = vmax.f32 %v289_v7, 0.0 }
 0x25d   :  { %v291_v9 = vpack.c.bf16 %v290_v8, %v290_v8 }
 0x25f   :  { %368 = vmatmul.bf16.vlgmr.msra.gmra.mxu2 %v291_v9 }
 0x2e2   :  { %v369_v11 = vpop.f32.mrf.mxu2 }
 0x2e3   :  { %v370_v12 = vadd.f32 %v502_v10, %v369_v11 }
 0x2e5   :  { %507 = vtanh.f32 %v370_v12 }
 0x2ea   :  { %v371_v13 = vpop.f32.mrf.mxu2 }
 0x2eb   :  { %v508_v14 = vpop.eup %507 }
 0x2ec   :  { %375 = vst.msk [vmem:[#allocation13] sm:$0xff] %vm374_vm7, %v508_v14 }
 0x2ed   :  { %386 = dma.vmem_to_hbm [thread:$0]  %s382_s30, 128, %s384_s10, [#allocation4]  }
 0x2ee   :  { %685 = dma.done.wait [#allocation4], 128  }
 0x2ef   :  { %686 = vsyncadd [#allocation4], 4294967168 }
 0x2f0   :  { %391 = vsyncpa [#allocation3], 1 }
 0x2f1   :  { %392 = vsyncpa [#allocation6], 1 }
 0x2f2   :  { %393 = vsyncpa [#allocation9], 1 }
 0x2f3   :  { %394 = vsyncpa [#allocation12], 1 }
 0x2f4   :  { %395 = vsyncpa [#allocation4], 1 }

</bundles_post_ra>
